<compile_context>
chip_gen: v7x
topology: tpu7x:2x2x1
jax: 0.10.0
libtpu: 0.0.40
codegen_flags: <defaults>
</compile_context>

<pallas_src>
import jax
import jax.numpy as jnp
from jax.experimental import pallas as pl
from jax.experimental.pallas import tpu as pltpu

# ----------------------------- configuration --------------------------------
B = 2                  # batch
C = 3                  # image channels
H = W = 16             # spatial
P = 4                  # patch size
NP = (H // P) * (W // P)          # 16 image patches per image
CPP = C * P * P                   # 48 = flattened patch vector
D_VIS = 32             # config.vision_encoder_hidden_size
D_TXT = 32             # config.text_decoder_hidden_size
VOCAB = 64             # config.vocab_size
V_PAD = 128            # vocab padded to a full lane width (lane-dense stores)
T_TXT = 8              # text sequence length
T_TOT = NP + T_TXT     # 24 tokens per batch element
ROWS = B * T_TOT       # 48 rows processed in one shot (batch flattened)
SCALE = 1.0 / float(D_TXT) ** 0.5
NEG_INF = -1e30


# ------------------------------- kernel --------------------------------------
def _fused_forward_kernel(patch_rows_ref, text_rows_ref, w_pe_ref, w_qkv_ref,
                          w_o_ref, w_lm_ref, attn_mask_ref, lm_mask_ref,
                          out_ref):
    """Entire VisualMQAR forward for the whole batch in one invocation.

    patch_rows : (ROWS, CPP)    bf16  unfolded patches in final row order
                                      (text rows are zero)
    text_rows  : (ROWS, D_TXT)  f32   token embeddings in final row order
                                      (image rows are zero)
    w_pe       : (CPP, D_TXT)   bf16  patch-embed @ vision_projector (folded)
    w_qkv      : (D_TXT, 3*D)   bf16  fused [Wq | Wk | Wv]
    w_o        : (D_TXT, D_TXT) bf16
    w_lm       : (D_TXT, V_PAD) bf16  lm_head weight, zero-padded to 128
    attn_mask  : (ROWS, ROWS)   f32   additive block-diag causal mask
    lm_mask    : (1, V_PAD)     f32   additive mask (-inf on pad columns)
    out        : (ROWS, V_PAD)  f32   softmax probabilities (lane dense)
    """
    # ---- vision encoder + projector + stream merge: one matmul + one add ---
    # Image rows: patch_vec @ w_pe (text rows contribute 0); text rows: embed.
    x = jnp.dot(patch_rows_ref[...], w_pe_ref[...],
                preferred_element_type=jnp.float32) + text_rows_ref[...]
    xb = x.astype(jnp.bfloat16)                                   # (ROWS, D_TXT)

    # ---- single-layer causal self-attention + residual ----------------------
    qkv = jnp.dot(xb, w_qkv_ref[...],
                  preferred_element_type=jnp.float32)             # (ROWS, 3*D)
    q = qkv[:, 0:D_TXT]
    k = qkv[:, D_TXT:2 * D_TXT]
    v = qkv[:, 2 * D_TXT:3 * D_TXT]

    # Transpose-free Q.K^T: contract the last dim of both operands.
    s = jax.lax.dot_general(q, k, dimension_numbers=(((1,), (1,)), ((), ())),
                            preferred_element_type=jnp.float32)   # (ROWS, ROWS)
    s = s * jnp.float32(SCALE) + attn_mask_ref[...]               # block-diag causal

    m = jnp.max(s, axis=-1, keepdims=True)
    e = jnp.exp(s - m)
    p = e * pl.reciprocal(jnp.sum(e, axis=-1, keepdims=True), approx=True)

    attn = jnp.dot(p.astype(jnp.bfloat16), v.astype(jnp.bfloat16),
                   preferred_element_type=jnp.float32)            # (ROWS, D_TXT)
    h = x + jnp.dot(attn.astype(jnp.bfloat16), w_o_ref[...],
                    preferred_element_type=jnp.float32)           # residual, f32

    # ---- lm_head: Linear(bias=False) + Softmax(dim=-1), lane-padded vocab ---
    logits = jnp.dot(h.astype(jnp.bfloat16), w_lm_ref[...],
                     preferred_element_type=jnp.float32)          # (ROWS, V_PAD)
    logits = logits + lm_mask_ref[...]                            # pad cols -> -inf
    lm = jnp.max(logits, axis=-1, keepdims=True)
    le = jnp.exp(logits - lm)
    # exact division (not approx vrcp) so softmax rows sum to 1 within 1e-5
    out_ref[...] = le / jnp.sum(le, axis=-1, keepdims=True)


# ------------------------------ wrapper ---------------------------------------
def fused_forward(patch_rows, text_rows, fw):
    vmem = lambda: pl.BlockSpec(memory_space=pltpu.MemorySpace.VMEM)
    return pl.pallas_call(
        _fused_forward_kernel,
        out_shape=jax.ShapeDtypeStruct((ROWS, V_PAD), jnp.float32),
        in_specs=[vmem() for _ in range(8)],
        out_specs=vmem(),
    )(patch_rows, text_rows, fw["w_pe"], fw["w_qkv"], fw["w_o"], fw["w_lm"],
      fw["attn_mask"], fw["lm_mask"])


# ------------------------------ model glue ------------------------------------
def init_params(key):
    ks = jax.random.split(key, 9)
    scale = 0.02
    return {
        # patch-embedding conv (kernel=stride=P, no bias), flattened to a matmul
        "w_patch": scale * jax.random.normal(ks[0], (CPP, D_VIS), jnp.float32),
        # vision_projector: Linear(D_VIS, D_TXT, bias=False)
        "w_proj": scale * jax.random.normal(ks[1], (D_VIS, D_TXT), jnp.float32),
        # text decoder token embedding table
        "embed_table": scale * jax.random.normal(ks[2], (VOCAB, D_TXT), jnp.float32),
        # single-layer causal attention decoder (stand-in for AutoModel)
        "wq": scale * jax.random.normal(ks[3], (D_TXT, D_TXT), jnp.float32),
        "wk": scale * jax.random.normal(ks[4], (D_TXT, D_TXT), jnp.float32),
        "wv": scale * jax.random.normal(ks[5], (D_TXT, D_TXT), jnp.float32),
        "wo": scale * jax.random.normal(ks[6], (D_TXT, D_TXT), jnp.float32),
        # lm_head: Linear(D_TXT, VOCAB, bias=False) stored as (D_TXT, VOCAB)
        "w_lm": scale * jax.random.normal(ks[7], (D_TXT, VOCAB), jnp.float32),
    }


def prepare_fused_weights(params):
    """Offline weight folding / fusion / padding + host-side mask construction."""
    # CLS prepend + [:, 1:] drop is a no-op for the synthetic encoder, so the
    # vision_projector folds straight into the patch-embed weight.
    # TODO(synk): the pretrained CLIP transformer stack is not reproduced; only
    # the patch embedding is kept as the synthetic vision encoder.
    w_pe = (params["w_patch"] @ params["w_proj"]).astype(jnp.bfloat16)
    w_qkv = jnp.concatenate([params["wq"], params["wk"], params["wv"]],
                            axis=1).astype(jnp.bfloat16)          # (D, 3D)
    w_o = params["wo"].astype(jnp.bfloat16)
    w_lm = jnp.pad(params["w_lm"],
                   ((0, 0), (0, V_PAD - VOCAB))).astype(jnp.bfloat16)
    lm_mask = jnp.where(jnp.arange(V_PAD) < VOCAB, 0.0,
                        NEG_INF).astype(jnp.float32).reshape(1, V_PAD)
    # block-diagonal (per-batch) causal additive mask over the flattened rows
    idx = jnp.arange(ROWS)
    bi, pos = idx // T_TOT, idx % T_TOT
    allowed = (bi[:, None] == bi[None, :]) & (pos[None, :] <= pos[:, None])
    attn_mask = jnp.where(allowed, 0.0, NEG_INF).astype(jnp.float32)
    return {"w_pe": w_pe, "w_qkv": w_qkv, "w_o": w_o, "w_lm": w_lm,
            "lm_mask": lm_mask, "attn_mask": attn_mask}


def extract_patches(images):
    """NCHW -> (B, NP, C*P*P) row-major patch vectors (pure reshape glue)."""
    b, c, h, w = images.shape
    x = images.reshape(b, c, h // P, P, w // P, P)
    x = x.transpose(0, 2, 4, 1, 3, 5)             # (B, H/P, W/P, C, P, P)
    return x.reshape(b, (h // P) * (w // P), c * P * P)


def build_row_streams(patches, text_embeds):
    """Lay both token streams out in the final flattened row order.

    patches     : (B, NP, CPP)    -> rows [b*T_TOT : b*T_TOT+NP]
    text_embeds : (B, T_TXT, D)   -> rows [b*T_TOT+NP : (b+1)*T_TOT]
    Image rows of the text stream (and text rows of the patch stream) are zero,
    so the kernel merges them with a single matmul + add (no in-kernel concat).
    """
    patch_rows = jnp.concatenate(
        [patches, jnp.zeros((B, T_TXT, CPP), patches.dtype)], axis=1
    ).reshape(ROWS, CPP)
    text_rows = jnp.concatenate(
        [jnp.zeros((B, NP, D_TXT), text_embeds.dtype), text_embeds], axis=1
    ).reshape(ROWS, D_TXT)
    return patch_rows, text_rows


def visual_mqar_forward(params, fused_w, samples):
    # preparing_embedding (unfold + embedding gather are XLA-side layout glue)
    patches = extract_patches(samples["images"]).astype(jnp.bfloat16)
    text = jnp.take(params["embed_table"], samples["input_ids"], axis=0)
    patch_rows, text_rows = build_row_streams(patches, text)
    # entire forward (encoder matmul, decoder attention, lm_head+softmax) fused
    probs_pad = fused_forward(patch_rows, text_rows, fused_w)    # (ROWS, 128)
    logits = probs_pad.reshape(B, T_TOT, V_PAD)[:, :, :VOCAB]
    return logits, samples["labels"]


# --------------------------- pure-JAX reference --------------------------------
def reference_forward(fused_w, patch_rows, text_rows):
    x = jnp.dot(patch_rows, fused_w["w_pe"],
                preferred_element_type=jnp.float32) + text_rows
    xb = x.astype(jnp.bfloat16)
    qkv = jnp.dot(xb, fused_w["w_qkv"], preferred_element_type=jnp.float32)
    q, k, v = qkv[:, :D_TXT], qkv[:, D_TXT:2 * D_TXT], qkv[:, 2 * D_TXT:]
    s = (q @ k.T) * SCALE + fused_w["attn_mask"]
    p = jax.nn.softmax(s, axis=-1)
    attn = jnp.dot(p.astype(jnp.bfloat16), v.astype(jnp.bfloat16),
                   preferred_element_type=jnp.float32)
    h = x + jnp.dot(attn.astype(jnp.bfloat16), fused_w["w_o"],
                    preferred_element_type=jnp.float32)
    logits = jnp.dot(h.astype(jnp.bfloat16), fused_w["w_lm"],
                     preferred_element_type=jnp.float32) + fused_w["lm_mask"]
    return jax.nn.softmax(logits, axis=-1)


# --------------------------------- main ---------------------------------------
if __name__ == "__main__":
    key = jax.random.PRNGKey(0)
    k_param, k_img, k_ids, k_lbl = jax.random.split(key, 4)

    params = init_params(k_param)
    fused_w = prepare_fused_weights(params)
    samples = {
        "images": jax.random.normal(k_img, (B, C, H, W), jnp.float32),   # NCHW
        "input_ids": jax.random.randint(k_ids, (B, T_TXT), 0, VOCAB, jnp.int32),
        "labels": jax.random.randint(k_lbl, (B, T_TXT), 0, VOCAB, jnp.int32),
    }

    logits, targets = visual_mqar_forward(params, fused_w, samples)
    jax.block_until_ready(logits)
    jax.block_until_ready(targets)

    assert logits.shape == (B, T_TOT, VOCAB)
    # softmax rows must sum to 1 (padded vocab columns carry exactly 0 mass)
    assert bool(jnp.allclose(jnp.sum(logits, axis=-1), 1.0, atol=1e-5))

    # numerical check against a pure-JAX reference of the same synthetic model
    patches = extract_patches(samples["images"]).astype(jnp.bfloat16)
    text = jnp.take(params["embed_table"], samples["input_ids"], axis=0)
    pr, tr = build_row_streams(patches, text)
    ref = reference_forward(fused_w, pr, tr).reshape(B, T_TOT, V_PAD)[:, :, :VOCAB]
    assert bool(jnp.allclose(logits, ref, atol=1e-3, rtol=1e-2))

    print("KERNEL_OK")
</pallas_src>

<mosaic_0001>
module attributes {stable_mosaic.version = 11 : i64} {
  func.func @_fused_forward_kernel(%arg0: memref<48x48xbf16, #tpu.memory_space<vmem>>, %arg1: memref<48x32xf32, #tpu.memory_space<vmem>>, %arg2: memref<48x32xbf16, #tpu.memory_space<vmem>>, %arg3: memref<32x96xbf16, #tpu.memory_space<vmem>>, %arg4: memref<32x32xbf16, #tpu.memory_space<vmem>>, %arg5: memref<32x128xbf16, #tpu.memory_space<vmem>>, %arg6: memref<48x48xf32, #tpu.memory_space<vmem>>, %arg7: memref<1x128xf32, #tpu.memory_space<vmem>>, %arg8: memref<48x128xf32, #tpu.memory_space<vmem>>) attributes {dimension_semantics = [], scalar_prefetch = 0 : i64, scratch_operands = 0 : i64, tpu.core_type = #tpu.core_type<tc>} {
    %c0 = arith.constant 0 : index
    %c0_0 = arith.constant 0 : index
    %0 = vector.load %arg0[%c0, %c0_0] : memref<48x48xbf16, #tpu.memory_space<vmem>>, vector<48x48xbf16>
    %c0_1 = arith.constant 0 : index
    %c0_2 = arith.constant 0 : index
    %1 = vector.load %arg2[%c0_1, %c0_2] : memref<48x32xbf16, #tpu.memory_space<vmem>>, vector<48x32xbf16>
    %cst = arith.constant dense<0.000000e+00> : vector<48x32xf32>
    %2 = tpu.matmul %0, %1, %cst {dimension_numbers = #tpu.dot_dimension_numbers<[1], [0], [0], [1], [0, 0, 1, 1], [], []>} : vector<48x48xbf16>, vector<48x32xbf16>, vector<48x32xf32> -> vector<48x32xf32>
    %c0_3 = arith.constant 0 : index
    %c0_4 = arith.constant 0 : index
    %3 = vector.load %arg1[%c0_3, %c0_4] : memref<48x32xf32, #tpu.memory_space<vmem>>, vector<48x32xf32>
    %4 = arith.addf %2, %3 : vector<48x32xf32>
    %5 = arith.truncf %4 : vector<48x32xf32> to vector<48x32xbf16>
    %c0_5 = arith.constant 0 : index
    %c0_6 = arith.constant 0 : index
    %6 = vector.load %arg3[%c0_5, %c0_6] : memref<32x96xbf16, #tpu.memory_space<vmem>>, vector<32x96xbf16>
    %cst_7 = arith.constant dense<0.000000e+00> : vector<48x96xf32>
    %7 = tpu.matmul %5, %6, %cst_7 {dimension_numbers = #tpu.dot_dimension_numbers<[1], [0], [0], [1], [0, 0, 1, 1], [], []>} : vector<48x32xbf16>, vector<32x96xbf16>, vector<48x96xf32> -> vector<48x96xf32>
    %8 = vector.extract_strided_slice %7 {offsets = [0, 0], sizes = [48, 32], strides = [1, 1]} : vector<48x96xf32> to vector<48x32xf32>
    %9 = vector.extract_strided_slice %7 {offsets = [0, 32], sizes = [48, 32], strides = [1, 1]} : vector<48x96xf32> to vector<48x32xf32>
    %10 = vector.extract_strided_slice %7 {offsets = [0, 64], sizes = [48, 32], strides = [1, 1]} : vector<48x96xf32> to vector<48x32xf32>
    %cst_8 = arith.constant dense<0.000000e+00> : vector<48x48xf32>
    %11 = tpu.matmul %8, %9, %cst_8 {dimension_numbers = #tpu.dot_dimension_numbers<[1], [1], [0], [0], [0, 0, 1, 0], [], []>} : vector<48x32xf32>, vector<48x32xf32>, vector<48x48xf32> -> vector<48x48xf32>
    %cst_9 = arith.constant 0.176776692 : f32
    %12 = vector.broadcast %cst_9 : f32 to vector<48x48xf32>
    %13 = arith.mulf %11, %12 : vector<48x48xf32>
    %c0_10 = arith.constant 0 : index
    %c0_11 = arith.constant 0 : index
    %14 = vector.load %arg6[%c0_10, %c0_11] : memref<48x48xf32, #tpu.memory_space<vmem>>, vector<48x48xf32>
    %15 = arith.addf %13, %14 : vector<48x48xf32>
    %cst_12 = arith.constant dense<0xFF800000> : vector<48xf32>
    %16 = vector.multi_reduction <maximumf>, %15, %cst_12 [1] : vector<48x48xf32> to vector<48xf32>
    %17 = vector.shape_cast %16 : vector<48xf32> to vector<48x1xf32>
    %18 = vector.broadcast %17 : vector<48x1xf32> to vector<48x48xf32>
    %19 = arith.subf %15, %18 : vector<48x48xf32>
    %20 = math.exp %19 : vector<48x48xf32>
    %cst_13 = arith.constant dense<0.000000e+00> : vector<48xf32>
    %21 = vector.multi_reduction <add>, %20, %cst_13 [1] : vector<48x48xf32> to vector<48xf32>
    %22 = vector.shape_cast %21 : vector<48xf32> to vector<48x1xf32>
    %23 = tpu.reciprocal %22 {approx = true} : vector<48x1xf32> -> vector<48x1xf32>
    %24 = vector.broadcast %23 : vector<48x1xf32> to vector<48x48xf32>
    %25 = arith.mulf %20, %24 : vector<48x48xf32>
    %26 = arith.truncf %25 : vector<48x48xf32> to vector<48x48xbf16>
    %27 = arith.truncf %10 : vector<48x32xf32> to vector<48x32xbf16>
    %cst_14 = arith.constant dense<0.000000e+00> : vector<48x32xf32>
    %28 = tpu.matmul %26, %27, %cst_14 {dimension_numbers = #tpu.dot_dimension_numbers<[1], [0], [0], [1], [0, 0, 1, 1], [], []>} : vector<48x48xbf16>, vector<48x32xbf16>, vector<48x32xf32> -> vector<48x32xf32>
    %29 = arith.truncf %28 : vector<48x32xf32> to vector<48x32xbf16>
    %c0_15 = arith.constant 0 : index
    %c0_16 = arith.constant 0 : index
    %30 = vector.load %arg4[%c0_15, %c0_16] : memref<32x32xbf16, #tpu.memory_space<vmem>>, vector<32x32xbf16>
    %cst_17 = arith.constant dense<0.000000e+00> : vector<48x32xf32>
    %31 = tpu.matmul %29, %30, %cst_17 {dimension_numbers = #tpu.dot_dimension_numbers<[1], [0], [0], [1], [0, 0, 1, 1], [], []>} : vector<48x32xbf16>, vector<32x32xbf16>, vector<48x32xf32> -> vector<48x32xf32>
    %32 = arith.addf %4, %31 : vector<48x32xf32>
    %33 = arith.truncf %32 : vector<48x32xf32> to vector<48x32xbf16>
    %c0_18 = arith.constant 0 : index
    %c0_19 = arith.constant 0 : index
    %34 = vector.load %arg5[%c0_18, %c0_19] : memref<32x128xbf16, #tpu.memory_space<vmem>>, vector<32x128xbf16>
    %cst_20 = arith.constant dense<0.000000e+00> : vector<48x128xf32>
    %35 = tpu.matmul %33, %34, %cst_20 {dimension_numbers = #tpu.dot_dimension_numbers<[1], [0], [0], [1], [0, 0, 1, 1], [], []>} : vector<48x32xbf16>, vector<32x128xbf16>, vector<48x128xf32> -> vector<48x128xf32>
    %c0_21 = arith.constant 0 : index
    %c0_22 = arith.constant 0 : index
    %36 = vector.load %arg7[%c0_21, %c0_22] : memref<1x128xf32, #tpu.memory_space<vmem>>, vector<1x128xf32>
    %37 = vector.broadcast %36 : vector<1x128xf32> to vector<48x128xf32>
    %38 = arith.addf %35, %37 : vector<48x128xf32>
    %cst_23 = arith.constant dense<0xFF800000> : vector<48xf32>
    %39 = vector.multi_reduction <maximumf>, %38, %cst_23 [1] : vector<48x128xf32> to vector<48xf32>
    %40 = vector.shape_cast %39 : vector<48xf32> to vector<48x1xf32>
    %41 = vector.broadcast %40 : vector<48x1xf32> to vector<48x128xf32>
    %42 = arith.subf %38, %41 : vector<48x128xf32>
    %43 = math.exp %42 : vector<48x128xf32>
    %cst_24 = arith.constant dense<0.000000e+00> : vector<48xf32>
    %44 = vector.multi_reduction <add>, %43, %cst_24 [1] : vector<48x128xf32> to vector<48xf32>
    %45 = vector.shape_cast %44 : vector<48xf32> to vector<48x1xf32>
    %46 = vector.broadcast %45 : vector<48x1xf32> to vector<48x128xf32>
    %47 = arith.divf %43, %46 : vector<48x128xf32>
    %c0_25 = arith.constant 0 : index
    %c0_26 = arith.constant 0 : index
    %48 = vector.load %arg8[%c0_25, %c0_26] : memref<48x128xf32, #tpu.memory_space<vmem>>, vector<48x128xf32>
    tpu.vector_store %arg8[%c0_25, %c0_26], %47 {strides = array<i32>} : memref<48x128xf32, #tpu.memory_space<vmem>>, vector<48x128xf32>,
    return
  }
}

</mosaic_0001>

<bundles_post_ra>
// kernel: tpu_custom_call.1
= control target key start
LH: loop header
LB: loop body
LE: loop exit
PB: predicated region body
PF: predicated region fallthrough
CT: control target
= control target key end

     0   :  { %13 = vsyncpa [#allocation3], 0  ;;  %s1449_s0 = inlined_call_operand.vmem [shape: bf16[48,48], index: 0, kind: input, shape index: {}]   ;;  %s1450_s1 = inlined_call_operand.vmem [shape: f32[48,32], index: 1, kind: input, shape index: {}]   ;;  %s1451_s2 = inlined_call_operand.vmem [shape: bf16[48,32], index: 2, kind: input, shape index: {}]   ;;  %s1452_s3 = inlined_call_operand.vmem [shape: bf16[32,96], index: 3, kind: input, shape index: {}]   ;;  %s1453_s4 = inlined_call_operand.hbm [shape: bf16[32,32], index: 4, kind: input, shape index: {}]   ;;  %s1454_s5 = inlined_call_operand.vmem [shape: bf16[32,128], index: 5, kind: input, shape index: {}]   ;;  %s1455_s6 = inlined_call_operand.vmem [shape: f32[48,48], index: 6, kind: input, shape index: {}]   ;;  %s1456_s7 = inlined_call_operand.vmem [shape: f32[1,128], index: 7, kind: input, shape index: {}]   ;;  %s1457_s8 = inlined_call_operand.hbm [shape: f32[48,128], index: 8, kind: output, shape index: {}]  }
   0x1   :  { %14 = vsyncpa [#allocation4], 0  ;;  %s1154_s27 = smov [#allocation2]   ;;  %s1106_s9 = scalar_lea.hbm %s1453_s4, 256 }
   0x2   :  { %s28_s28 = sshll.u32 %s1154_s27, 4  ;;  %p1107_p0 = scmp.ne.s32.totalorder %s1453_s4, %s1106_s9  ;;  %s29_s28 = int_to_ptr.vmem [resolvable:$true] %s28_s28 }
   0x3   :  { %p1110_p1 = scmp.lt.u32.totalorder %s1106_s9, %s1453_s4 }
   0x5   :  { %p1112_p2 = pnand %p1110_p1, %p1107_p0 }
   0x7   :  { %1115 = shalt.err (!%p1112_p2)
}
   0x8   :  { %s1116_s14 = scalar_lea.vmem %s29_s28, 256  ;;  %p1121_p4 = scmp.lt.s32.totalorder %s29_s28, %s29_s28 }
   0x9   :  { %p1117_p3 = scmp.ne.s32.totalorder %s29_s28, %s1116_s14  ;;  %p1122_p5 = scmp.lt.s32.totalorder %s1116_s14, %s1116_s14 }
   0xb   :  { %p1123_p6 = por %p1122_p5, %p1121_p4 }
   0xd   :  { %p1124_p7 = pnand %p1123_p6, %p1117_p3 }
   0xf   :  { %1127 = shalt.err (!%p1124_p7)
}
  0x10   :  { %s1155_s15 = smov 64   ;;  %s1156_s16 = smov 4  }
  0x11   :  { %34 = dma.hbm_to_vmem [thread:$0]  %s1453_s4, 256, %s29_s28, [#allocation3], %s1155_s15, %s1155_s15, %s1156_s16  }
  0x12   :  { %1150 = dma.done.wait [#allocation3], 256  }
  0x13   :  { %1151 = vsyncadd [#allocation3], 4294967040  ;;  %v1157_v0 = vmov 0.0   ;;  %vm1158_vm0 = vmmov 0   ;;  %v1046_v1 = vld [vmem:[%s1451_s2] sm:$0xff]   ;;  %v1047_v2 = vld [vmem:[%s1451_s2 + $0x8] sm:$0xff]  }
  0x14   :  { %893 = vmatprep.subr.bf16.mxu0 %v1157_v0  ;;  %899 = vmatprep.mubr.msk.bf16.mxu0 %vm1158_vm0, %v1157_v0  ;;  %v1048_v3 = vld [vmem:[%s1451_s2 + $0x10] sm:$0xff]   ;;  %v1049_v4 = vld [vmem:[%s1449_s0] sm:$0xff]   ;;  %vm96_vm1 = vcmask 392192   ;;  %v1050_v5 = vld [vmem:[%s1449_s0 + $0x8] sm:$0xff]   ;;  %vm182_vm2 = vcmask 261120  }
  0x15   :  { %911 = vmatprep.subr.bf16.mxu1 %v1157_v0  ;;  %915 = vmatprep.mubr.msk.bf16.mxu1 %vm1158_vm0, %v1157_v0  ;;  %v1051_v6 = vld [vmem:[%s1449_s0 + $0x10] sm:$0xff]   ;;  %v1052_v7 = vld [vmem:[%s1452_s3] sm:$0xff]   ;;  %v1053_v8 = vld [vmem:[%s1452_s3 + $0x8] sm:$0xff]  }
  0x16   :  { %894 = vmatpush3.bf16.msra.mxu0 %v1046_v1  ;;  %912 = vmatpush3.bf16.msra.mxu1 %v1052_v7  ;;  %v57_v9 = vld [vmem:[%s1450_s1] sm:$0xff]  ;;  %v58_v11 = vld [vmem:[%s1450_s1 + $0x8] sm:$0xff]  ;;  %v59_v18 = vld [vmem:[%s1450_s1 + $0x10] sm:$0xff] }
  0x17   :  { %895 = vmatprep.subr.bf16.mxu0 %v1157_v0  ;;  %913 = vmatprep.subr.bf16.mxu1 %v1157_v0  ;;  %v60_v20 = vld [vmem:[%s1450_s1 + $0x18] sm:$0xff]  ;;  %v61_v27 = vld [vmem:[%s1450_s1 + $0x20] sm:$0xff]  ;;  %v62_v29 = vld [vmem:[%s1450_s1 + $0x28] sm:$0xff]  ;;  %s1159_s1 = smov 96  }
  0x18   :  { %vm999_vm3 = vmpackc.low %vm182_vm2, %vm182_vm2  ;;  %v392_v7 = vld [vmem:[%s1455_s6] sm:$0xff] }
  0x1a   :  { %896 = vmatpush3.bf16.msra.mxu0 %v1047_v2  ;;  %914 = vmatpush3.bf16.msra.mxu1 %v1053_v8 }
  0x1b   :  { %897 = vmatprep.subr.bf16.mxu0 %v1157_v0 }
  0x1e   :  { %898 = vmatpush3.bf16.msra.mxu0 %v1048_v3 }
  0x1f   :  { %948 = vmatprep.subr.bf16.mxu0 %v1157_v0 }
  0x21   :  { %900 = vmatmul.mubr.msk.bf16.vlgmr.msra.gmra.mrb[0].mxu0 %vm96_vm1, %v1049_v4  ;;  %v393_v4 = vld [vmem:[%s1455_s6 + $0x8] sm:$0xff] }
  0x22   :  { %903 = vmatprep.mubr.msk.bf16.mxu0 %vm1158_vm0, %v1157_v0 }
  0x29   :  { %904 = vmatmul.mubr.msk.bf16.gmra.mrb[4].mxu0 %vm96_vm1, %v1050_v5 }
  0x2a   :  { %907 = vmatprep.mubr.msk.bf16.mxu0 %vm1158_vm0, %v1157_v0 }
  0x31   :  { %908 = vmatmul.mubr.msk.bf16.gmra.mrb[8].mxu0 %vm96_vm1, %v1051_v6 }
  0x32   :  { %954 = vmatprep.mubr.msk.bf16.mxu0 %vm1158_vm0, %v1157_v0 }
  0xf4   :  { %v140_v10 = vpop.f32.mrb[0].mxu0 }
  0xf5   :  { %v901_v12 = vpop.f32.mrb[1].mxu0  ;;  %v1271_v14 = vadd.f32 %v140_v10, %v57_v9 }
  0xf6   :  { %v143_v13 = vpop.f32.mrb[2].mxu0  ;;  %v395_v12 = vld [vmem:[%s1455_s6 + $0x18] sm:$0xff] }
  0xf7   :  { %v1273_v15 = vadd.f32 %v143_v13, %v58_v11  ;;  %v902_v16 = vpop.f32.mrb[3].mxu0 }
  0xf9   :  { %v163_v17 = vpack.c.bf16 %v1273_v15, %v1271_v14 }
  0xfb   :  { %916 = vmatmul.mubr.msk.bf16.vlgmr.msra.gmra.mrb[0].mxu1 %vm182_vm2, %v163_v17 }
  0xfc   :  { %v148_v19 = vpop.f32.mrb[4].mxu0  ;;  %919 = vmatprep.mubr.msk.bf16.mxu1 %vm1158_vm0, %v1157_v0 }
  0xfd   :  { %v905_v21 = vpop.f32.mrb[5].mxu0  ;;  %v1286_v23 = vadd.f32 %v148_v19, %v59_v18  ;;  %v394_v18 = vld [vmem:[%s1455_s6 + $0x10] sm:$0xff] }
  0xfe   :  { %v151_v22 = vpop.f32.mrb[6].mxu0 }
  0xff   :  { %v1288_v24 = vadd.f32 %v151_v22, %v60_v20  ;;  %v906_v25 = vpop.f32.mrb[7].mxu0 }
 0x101   :  { %v164_v26 = vpack.c.bf16 %v1288_v24, %v1286_v23 }
 0x103   :  { %920 = vmatmul.mubr.msk.bf16.gmra.mrb[4].mxu1 %vm182_vm2, %v164_v26  ;;  %v397_v26 = vld [vmem:[%s1455_s6 + $0x28] sm:$0xff] }
 0x104   :  { %v156_v28 = vpop.f32.mrb[8].mxu0  ;;  %923 = vmatprep.mubr.msk.bf16.mxu1 %vm1158_vm0, %v1157_v0 }
 0x105   :  { %v909_v30 = vpop.f32.mrb[9].mxu0  ;;  %v1301_v32 = vadd.f32 %v156_v28, %v61_v27 }
 0x106   :  { %v159_v31 = vpop.f32.mrb[10].mxu0  ;;  %v396_v30 = vld [vmem:[%s1455_s6 + $0x20] sm:$0xff] }
 0x107   :  { %v1303_v33 = vadd.f32 %v159_v31, %v62_v29  ;;  %v910_v34 = vpop.f32.mrb[11].mxu0 }
 0x109   :  { %v165_v35 = vpack.c.bf16 %v1303_v33, %v1301_v32 }
 0x10b   :  { %924 = vmatmul.mubr.msk.bf16.gmra.mrb[8].mxu1 %vm182_vm2, %v165_v35 }
 0x1ce   :  { %v1308_v36 = vpop.f32.mrb[0].mxu1 }
 0x1cf   :  { %v917_v37 = vpop.f32.mrb[1].mxu1  ;;  %939 = vmatprep.mubr.msk.f32.mxu1 %vm182_vm2, %v1308_v36 }
 0x1d0   :  { %v1312_v38 = vpop.f32.mrb[2].mxu1 }
 0x1d1   :  { %v918_v39 = vpop.f32.mrb[3].mxu1  ;;  %v1031_v40 = vpack.i.bf16 %v1312_v38, %v1308_v36  ;;  %v473_v41 = vpack.c.bf16 %v1312_v38, %v1308_v36 }
 0x1d3   :  { %1032 = vrot.lane.b32.xlu0 %v1031_v40, %s1159_s1 }
 0x1d6   :  { %v1318_v42 = vpop.f32.mrb[4].mxu1 }
 0x1d7   :  { %v921_v43 = vpop.f32.mrb[5].mxu1 }
 0x1d8   :  { %v1320_v44 = vpop.f32.mrb[6].mxu1 }
 0x1d9   :  { %v1036_v45 = vpack.i.bf16 %v1320_v44, %v1318_v42  ;;  %v922_v46 = vpop.f32.mrb[7].mxu1  ;;  %v474_v47 = vpack.c.bf16 %v1320_v44, %v1318_v42 }
 0x1db   :  { %1037 = vrot.lane.b32.xlu0 %v1036_v45, %s1159_s1 }
 0x1de   :  { %v1326_v48 = vpop.f32.mrb[8].mxu1 }
 0x1df   :  { %v925_v49 = vpop.f32.mrb[9].mxu1 }
 0x1e0   :  { %v1328_v50 = vpop.f32.mrb[10].mxu1 }
 0x1e1   :  { %v926_v51 = vpop.f32.mrb[11].mxu1  ;;  %v1041_v52 = vpack.i.bf16 %v1328_v50, %v1326_v48  ;;  %v475_v53 = vpack.c.bf16 %v1328_v50, %v1326_v48 }
 0x1e3   :  { %1042 = vrot.lane.b32.xlu1 %v1041_v52, %s1159_s1 }
 0x245   :  { %v1033_v54 = vpop.permute.xlu0 %1032 }
 0x246   :  { %v1035_v55 = vunpack.i.h.bf16 %v1033_v54  ;;  %v1034_v56 = vunpack.i.l.bf16 %v1033_v54 }
 0x248   :  { %v998_v57 = vpack.c.bf16 %v1035_v55, %v1034_v56 }
 0x24a   :  { %1000 = vmatprep.subr.msk.bf16.mxu1 %vm999_vm3, %v998_v57 }
 0x24b   :  { %1003 = vmatpush3.bf16.xpose.msk.msra.mxu1 %vm999_vm3, %v998_v57 }
 0x24d   :  { %v1038_v58 = vpop.permute.xlu0 %1037 }
 0x24e   :  { %v1040_v59 = vunpack.i.h.bf16 %v1038_v58  ;;  %v1039_v60 = vunpack.i.l.bf16 %v1038_v58 }
 0x250   :  { %v1004_v61 = vpack.c.bf16 %v1040_v59, %v1039_v60 }
 0x252   :  { %1006 = vmatprep.subr.msk.bf16.mxu1 %vm999_vm3, %v1004_v61 }
 0x253   :  { %1009 = vmatpush3.bf16.xpose.msk.msra.mxu1 %vm999_vm3, %v1004_v61 }
 0x255   :  { %v1043_v62 = vpop.permute.xlu1 %1042 }
 0x256   :  { %v1045_v63 = vunpack.i.h.bf16 %v1043_v62  ;;  %v1044_v1 = vunpack.i.l.bf16 %v1043_v62 }
 0x258   :  { %v1010_v2 = vpack.c.bf16 %v1045_v63, %v1044_v1 }
 0x25a   :  { %1012 = vmatprep.subr.msk.bf16.mxu1 %vm999_vm3, %v1010_v2 }
 0x25b   :  { %1015 = vmatpush3.bf16.xpose.msk.msra.mxu1 %vm999_vm3, %v1010_v2 }
 0x25c   :  { %1016 = vmatprep.subr.bf16.mxu1 %v1157_v0 }
 0x262   :  { %940 = vmatmul.mubr.msk.f32.vlgmr.msra.gmra.mrb[12].mxu1 %vm182_vm2, %v1312_v38 }
 0x263   :  { %942 = vmatprep.mubr.msk.f32.mxu1 %vm182_vm2, %v1318_v42 }
 0x266   :  { %943 = vmatmul.mubr.msk.f32.gmra.mrb[14].mxu1 %vm182_vm2, %v1320_v44 }
 0x267   :  { %945 = vmatprep.mubr.msk.f32.mxu1 %vm182_vm2, %v1326_v48 }
 0x26a   :  { %946 = vmatmul.mubr.msk.f32.gmra.mrb[16].mxu1 %vm182_vm2, %v1328_v50 }
 0x26b   :  { %962 = vmatprep.mubr.msk.bf16.mxu1 %vm1158_vm0, %v1157_v0 }
 0x335   :  { %v941_v3 = vpop.f32.mrb[12].mxu1 }
 0x336   :  { %v387_v5 = vmul.f32 0.17677669, %v941_v3  ;;  %v357_v6 = vpop.f32.mrb[13].mxu1 }
 0x337   :  { %v386_v8 = vmul.f32 0.17677669, %v357_v6 }
 0x338   :  { %v399_v9 = vadd.f32 %v393_v4, %v387_v5 }
 0x339   :  { %v944_v10 = vpop.f32.mrb[14].mxu1  ;;  %v398_v11 = vadd.f32 %v392_v7, %v386_v8 }
 0x33a   :  { %v389_v13 = vmul.f32 0.17677669, %v944_v10  ;;  %v367_v16 = vpop.f32.mrb[15].mxu1  ;;  %v407_v17 = vsel %vm96_vm1, %v399_v9, -inf }
 0x33b   :  { %v388_v19 = vmul.f32 0.17677669, %v367_v16  ;;  %408 = vmax.xlane.f32.xlu0 %v407_v17  ;;  %v404_v20 = vsel %vm96_vm1, %v398_v11, -inf }
 0x33c   :  { %405 = vmax.xlane.f32.xlu1 %v404_v20  ;;  %v401_v21 = vadd.f32 %v395_v12, %v389_v13 }
 0x33d   :  { %v947_v22 = vpop.f32.mrb[16].mxu1  ;;  %v400_v25 = vadd.f32 %v394_v18, %v388_v19 }
 0x33e   :  { %v391_v27 = vmul.f32 0.17677669, %v947_v22  ;;  %v377_v28 = vpop.f32.mrb[17].mxu1  ;;  %v413_v29 = vsel %vm96_vm1, %v401_v21, -inf }
 0x33f   :  { %v390_v31 = vmul.f32 0.17677669, %v377_v28  ;;  %v410_v34 = vsel %vm96_vm1, %v400_v25, -inf }
 0x340   :  { %414 = vmax.xlane.f32.xlu1 %v413_v29  ;;  %411 = vmax.xlane.f32.xlu0 %v410_v34  ;;  %v403_v35 = vadd.f32 %v397_v26, %v391_v27  ;;  %v1054_v27 = vld [vmem:[#allocation2] sm:$0xff]  }
 0x341   :  { %v402_v37 = vadd.f32 %v396_v30, %v390_v31 }
 0x342   :  { %v419_v39 = vsel %vm96_vm1, %v403_v35, -inf }
 0x343   :  { %v416_v40 = vsel %vm96_vm1, %v402_v37, -inf }
 0x344   :  { %420 = vmax.xlane.f32.xlu1 %v419_v39  ;;  %417 = vmax.xlane.f32.xlu0 %v416_v40  ;;  %v1055_v39 = vld [vmem:[#allocation2 + $0x8] sm:$0xff]  }
 0x3c8   :  { %v409_v43 = vpop.xlane.xlu0 %408 }
 0x3c9   :  { %v423_v45 = vsub.f32 %v399_v9, %v409_v43  ;;  %v406_v46 = vpop.xlane.xlu1 %405 }
 0x3ca   :  { %v422_v49 = vsub.f32 %v398_v11, %v406_v46 }
 0x3cb   :  { %v430_v51 = vmul.f32 1.442695, %v423_v45 }
 0x3cc   :  { %v428_v52 = vmul.f32 1.442695, %v422_v49 }
 0x3cd   :  { %1058 = vpow2.f32 %v430_v51  ;;  %v415_v54 = vpop.xlane.xlu1 %414  ;;  %v412_v55 = vpop.xlane.xlu0 %411 }
 0x3ce   :  { %1060 = vpow2.f32 %v428_v52  ;;  %v425_v56 = vsub.f32 %v401_v21, %v415_v54  ;;  %v424_v57 = vsub.f32 %v400_v25, %v412_v55 }
 0x3d0   :  { %v434_v58 = vmul.f32 1.442695, %v425_v56  ;;  %v432_v59 = vmul.f32 1.442695, %v424_v57 }
 0x3d1   :  { %v421_v60 = vpop.xlane.xlu1 %420  ;;  %v418_v61 = vpop.xlane.xlu0 %417 }
 0x3d2   :  { %1062 = vpow2.f32 %v434_v58  ;;  %v427_v62 = vsub.f32 %v403_v35, %v421_v60  ;;  %v426_v63 = vsub.f32 %v402_v37, %v418_v61 }
 0x3d3   :  { %1064 = vpow2.f32 %v432_v59 }
 0x3d4   :  { %v438_v1 = vmul.f32 1.442695, %v427_v62  ;;  %v436_v2 = vmul.f32 1.442695, %v426_v63  ;;  %v1056_v62 = vld [vmem:[%s1454_s5] sm:$0xff]   ;;  %v1057_v63 = vld [vmem:[%s1454_s5 + $0x8] sm:$0xff]  }
 0x3d6   :  { %1066 = vpow2.f32 %v438_v1 }
 0x3d7   :  { %v1059_v3 = vpop.eup %1058  ;;  %1068 = vpow2.f32 %v436_v2 }
 0x3d8   :  { %v1061_v4 = vpop.eup %1060  ;;  %v443_v5 = vsel %vm96_vm1, %v1059_v3, 0.0 }
 0x3d9   :  { %444 = vadd.xlane.f32.xlu1 %v443_v5  ;;  %v440_v6 = vsel %vm96_vm1, %v1061_v4, 0.0 }
 0x3da   :  { %441 = vadd.xlane.f32.xlu0 %v440_v6 }
 0x3dc   :  { %v1063_v7 = vpop.eup %1062 }
 0x3dd   :  { %v1065_v8 = vpop.eup %1064  ;;  %v449_v9 = vsel %vm96_vm1, %v1063_v7, 0.0 }
 0x3de   :  { %450 = vadd.xlane.f32.xlu1 %v449_v9  ;;  %v446_v10 = vsel %vm96_vm1, %v1065_v8, 0.0 }
 0x3df   :  { %447 = vadd.xlane.f32.xlu0 %v446_v10 }
 0x3e0   :  { %v1067_v11 = vpop.eup %1066 }
 0x3e1   :  { %v1069_v12 = vpop.eup %1068  ;;  %v455_v13 = vsel %vm96_vm1, %v1067_v11, 0.0 }
 0x3e2   :  { %456 = vadd.xlane.f32.xlu1 %v455_v13  ;;  %v452_v16 = vsel %vm96_vm1, %v1069_v12, 0.0 }
 0x3e3   :  { %453 = vadd.xlane.f32.xlu0 %v452_v16 }
 0x3f3   :  { %481 = vrot.lane.b32.xlu1 %v474_v47, %s1155_s15 }
 0x3f7   :  { %483 = vrot.lane.b32.xlu1 %v475_v53, %s1155_s15 }
 0x3f9   :  { %479 = vrot.lane.b32.xlu0 %v473_v41, %s1155_s15 }
 0x466   :  { %v445_v17 = vpop.xlane.xlu1 %444 }
 0x467   :  { %v442_v18 = vpop.xlane.xlu0 %441  ;;  %1070 = vrcp.f32 %v445_v17 }
 0x468   :  { %1072 = vrcp.f32 %v442_v18 }
 0x46b   :  { %v451_v19 = vpop.xlane.xlu1 %450 }
 0x46c   :  { %v448_v20 = vpop.xlane.xlu0 %447 }
 0x46f   :  { %v457_v21 = vpop.xlane.xlu1 %456 }
 0x470   :  { %1074 = vrcp.f32 %v457_v21  ;;  %v454_v42 = vpop.xlane.xlu0 %453 }
 0x471   :  { %1076 = vrcp.f32 %v454_v42  ;;  %v1071_v47 = vpop.eup %1070 }
 0x472   :  { %1078 = vrcp.f32 %v451_v19  ;;  %v1073_v36 = vpop.eup %1072  ;;  %v465_v41 = vmul.f32 %v1071_v47, %v1059_v3 }
 0x473   :  { %1080 = vrcp.f32 %v448_v20  ;;  %v482_v48 = vpop.permute.xlu1 %481  ;;  %v464_v50 = vmul.f32 %v1073_v36, %v1061_v4 }
 0x474   :  { %v480_v44 = vpop.permute.xlu0 %479 }
 0x475   :  { %949 = vmatpush3.bf16.msra.mxu0 %v480_v44  ;;  %1019 = vmatpush3.bf16.msra.mxu1 %v480_v44  ;;  %v470_v29 = vpack.c.bf16 %v465_v41, %v464_v50 }
 0x476   :  { %950 = vmatprep.subr.bf16.mxu0 %v1157_v0  ;;  %1017 = vmatprep.subr.bf16.mxu1 %v1157_v0 }
 0x477   :  { %v484_v26 = vpop.permute.xlu1 %483 }
 0x479   :  { %951 = vmatpush3.bf16.msra.mxu0 %v482_v48  ;;  %1020 = vmatpush3.bf16.msra.mxu1 %v482_v48 }
 0x47a   :  { %v1075_v38 = vpop.eup %1074  ;;  %952 = vmatprep.subr.bf16.mxu0 %v1157_v0  ;;  %1018 = vmatprep.subr.bf16.mxu1 %v1157_v0 }
 0x47b   :  { %v1077_v53 = vpop.eup %1076  ;;  %v469_v22 = vmul.f32 %v1075_v38, %v1067_v11 }
 0x47c   :  { %v468_v25 = vmul.f32 %v1077_v53, %v1069_v12  ;;  %v1079_v28 = vpop.eup %1078 }
 0x47d   :  { %953 = vmatpush3.bf16.msra.mxu0 %v484_v26  ;;  %1021 = vmatpush3.bf16.msra.mxu1 %v484_v26  ;;  %v1081_v31 = vpop.eup %1080  ;;  %v467_v35 = vmul.f32 %v1079_v28, %v1063_v7 }
 0x47e   :  { %v472_v30 = vpack.c.bf16 %v469_v22, %v468_v25  ;;  %966 = vmatprep.subr.bf16.mxu1 %v1157_v0  ;;  %982 = vmatprep.subr.bf16.mxu0 %v1157_v0  ;;  %v466_v34 = vmul.f32 %v1081_v31, %v1065_v8 }
 0x480   :  { %955 = vmatmul.mubr.msk.bf16.vlgmr.msra.gmra.mrb[12].mxu0 %vm96_vm1, %v470_v29  ;;  %963 = vmatmul.mubr.msk.bf16.vlgmr.msra.gmra.mrb[20].mxu1 %vm96_vm1, %v472_v30  ;;  %v471_v37 = vpack.c.bf16 %v467_v35, %v466_v34 }
 0x481   :  { %958 = vmatprep.mubr.msk.bf16.mxu0 %vm1158_vm0, %v1157_v0  ;;  %967 = vmatpush3.bf16.msra.mxu1 %v1054_v27 }
 0x482   :  { %968 = vmatprep.subr.bf16.mxu1 %v1157_v0  ;;  %970 = vmatprep.mubr.msk.bf16.mxu1 %vm1158_vm0, %v1157_v0 }
 0x483   :  { %983 = vmatpush3.bf16.msra.mxu0 %v1056_v62 }
 0x484   :  { %984 = vmatprep.subr.bf16.mxu0 %v1157_v0 }
 0x485   :  { %969 = vmatpush3.bf16.msra.mxu1 %v1055_v39 }
 0x487   :  { %985 = vmatpush3.bf16.msra.mxu0 %v1057_v63 }
 0x488   :  { %959 = vmatmul.mubr.msk.bf16.gmra.mrb[16].mxu0 %vm96_vm1, %v471_v37 }
 0x489   :  { %986 = vmatprep.mubr.msk.bf16.mxu0 %vm1158_vm0, %v1157_v0 }
 0x553   :  { %v531_v40 = vpop.f32.mrb[12].mxu0  ;;  %v547_v43 = vpop.f32.mrb[20].mxu1 }
 0x554   :  { %v956_v45 = vpop.f32.mrb[13].mxu0  ;;  %v964_v46 = vpop.f32.mrb[21].mxu1 }
 0x555   :  { %v534_v49 = vpop.f32.mrb[14].mxu0  ;;  %v550_v51 = vpop.f32.mrb[22].mxu1 }
 0x556   :  { %v554_v52 = vpack.c.bf16 %v534_v49, %v531_v40  ;;  %v556_v54 = vpack.c.bf16 %v550_v51, %v547_v43  ;;  %v957_v55 = vpop.f32.mrb[15].mxu0  ;;  %v965_v56 = vpop.f32.mrb[23].mxu1 }
 0x558   :  { %971 = vmatmul.mubr.msk.bf16.vlgmr.msra.gmra.mrb[24].mxu1 %vm182_vm2, %v554_v52 }
 0x559   :  { %974 = vmatprep.mubr.msk.bf16.mxu1 %vm1158_vm0, %v1157_v0 }
 0x55b   :  { %v539_v57 = vpop.f32.mrb[16].mxu0 }
 0x55c   :  { %v960_v58 = vpop.f32.mrb[17].mxu0 }
 0x55d   :  { %v542_v59 = vpop.f32.mrb[18].mxu0 }
 0x55e   :  { %v555_v60 = vpack.c.bf16 %v542_v59, %v539_v57  ;;  %v961_v61 = vpop.f32.mrb[19].mxu0 }
 0x560   :  { %975 = vmatmul.mubr.msk.bf16.gmra.mrb[28].mxu1 %vm182_vm2, %v555_v60 }
 0x561   :  { %978 = vmatprep.mubr.msk.bf16.mxu1 %vm1158_vm0, %v1157_v0 }
 0x568   :  { %979 = vmatmul.mubr.msk.bf16.gmra.mrb[32].mxu1 %vm182_vm2, %v556_v54 }
 0x62b   :  { %v616_v1 = vpop.f32.mrb[24].mxu1 }
 0x62c   :  { %v972_v2 = vpop.f32.mrb[25].mxu1  ;;  %v639_v4 = vadd.f32 %v616_v1, %v1271_v14 }
 0x62d   :  { %v619_v3 = vpop.f32.mrb[26].mxu1 }
 0x62e   :  { %v640_v5 = vadd.f32 %v619_v3, %v1273_v15  ;;  %v973_v6 = vpop.f32.mrb[27].mxu1 }
 0x630   :  { %v645_v7 = vpack.c.bf16 %v640_v5, %v639_v4 }
 0x632   :  { %987 = vmatmul.mubr.msk.bf16.vlgmr.msra.gmra.mrb[20].mxu0 %vm182_vm2, %v645_v7 }
 0x633   :  { %v624_v8 = vpop.f32.mrb[28].mxu1  ;;  %990 = vmatprep.mubr.msk.bf16.mxu0 %vm1158_vm0, %v1157_v0 }
 0x634   :  { %v976_v9 = vpop.f32.mrb[29].mxu1  ;;  %v641_v11 = vadd.f32 %v624_v8, %v1286_v23  ;;  %v848_v23 = vld [vmem:[%s1456_s7] ss:$0 sm:$0xff]  ;;  %s1160_s7 = smov [#allocation5]  }
 0x635   :  { %v627_v10 = vpop.f32.mrb[30].mxu1  ;;  %s802_s0 = sshll.u32 %s1160_s7, 4  ;;  %s803_s0 = int_to_ptr.vmem [resolvable:$true] %s802_s0 }
 0x636   :  { %v642_v12 = vadd.f32 %v627_v10, %v1288_v24  ;;  %v977_v13 = vpop.f32.mrb[31].mxu1  ;;  %s1128_s13 = scalar_lea.vmem %s803_s0, 768  ;;  %p1133_p9 = scmp.lt.s32.totalorder %s803_s0, %s803_s0 }
 0x637   :  { %p1129_p8 = scmp.ne.s32.totalorder %s803_s0, %s1128_s13  ;;  %p1134_p10 = scmp.lt.s32.totalorder %s1128_s13, %s1128_s13 }
 0x638   :  { %v646_v16 = vpack.c.bf16 %v642_v12, %v641_v11 }
 0x639   :  { %p1135_p11 = por %p1134_p10, %p1133_p9 }
 0x63a   :  { %991 = vmatmul.mubr.msk.bf16.gmra.mrb[24].mxu0 %vm182_vm2, %v646_v16 }
 0x63b   :  { %v632_v14 = vpop.f32.mrb[32].mxu1  ;;  %994 = vmatprep.mubr.msk.bf16.mxu0 %vm1158_vm0, %v1157_v0  ;;  %p1136_p12 = pnand %p1135_p11, %p1129_p8 }
 0x63c   :  { %v980_v15 = vpop.f32.mrb[33].mxu1  ;;  %v643_v18 = vadd.f32 %v632_v14, %v1301_v32 }
 0x63d   :  { %v635_v17 = vpop.f32.mrb[34].mxu1 }
 0x63e   :  { %v644_v19 = vadd.f32 %v635_v17, %v1303_v33  ;;  %v981_v20 = vpop.f32.mrb[35].mxu1 }
 0x640   :  { %v647_v21 = vpack.c.bf16 %v644_v19, %v643_v18 }
 0x642   :  { %995 = vmatmul.mubr.msk.bf16.gmra.mrb[28].mxu0 %vm182_vm2, %v647_v21 }
 0x705   :  { %v714_v24 = vpop.f32.mrb[20].mxu0 }
 0x706   :  { %v715_v42 = vadd.f32 %v848_v23, %v714_v24  ;;  %v988_v44 = vpop.f32.mrb[21].mxu0 }
 0x707   :  { %v717_v47 = vpop.f32.mrb[22].mxu0 }
 0x708   :  { %v718_v48 = vadd.f32 %v848_v23, %v717_v47  ;;  %737 = vmax.xlane.f32.xlu0 %v715_v42  ;;  %v989_v0 = vpop.f32.mrb[23].mxu0 }
 0x70a   :  { %739 = vmax.xlane.f32.xlu1 %v718_v48 }
 0x70d   :  { %v722_v36 = vpop.f32.mrb[24].mxu0 }
 0x70e   :  { %v723_v32 = vadd.f32 %v848_v23, %v722_v36  ;;  %v992_v38 = vpop.f32.mrb[25].mxu0 }
 0x70f   :  { %v725_v33 = vpop.f32.mrb[26].mxu0 }
 0x710   :  { %741 = vmax.xlane.f32.xlu0 %v723_v32  ;;  %v993_v41 = vpop.f32.mrb[27].mxu0  ;;  %v726_v50 = vadd.f32 %v848_v23, %v725_v33 }
 0x714   :  { %743 = vmax.xlane.f32.xlu0 %v726_v50 }
 0x715   :  { %v730_v53 = vpop.f32.mrb[28].mxu0 }
 0x716   :  { %v731_v22 = vadd.f32 %v848_v23, %v730_v53  ;;  %v996_v25 = vpop.f32.mrb[29].mxu0 }
 0x717   :  { %v733_v26 = vpop.f32.mrb[30].mxu0 }
 0x718   :  { %v734_v27 = vadd.f32 %v848_v23, %v733_v26  ;;  %745 = vmax.xlane.f32.xlu1 %v731_v22  ;;  %v997_v28 = vpop.f32.mrb[31].mxu0 }
 0x71a   :  { %747 = vmax.xlane.f32.xlu0 %v734_v27 }
 0x795   :  { %v738_v29 = vpop.xlane.xlu0 %737 }
 0x796   :  { %v749_v30 = vsub.f32 %v715_v42, %v738_v29 }
 0x797   :  { %v740_v31 = vpop.xlane.xlu1 %739 }
 0x798   :  { %v755_v34 = vmul.f32 1.442695, %v749_v30  ;;  %v750_v35 = vsub.f32 %v718_v48, %v740_v31 }
 0x79a   :  { %1082 = vpow2.f32 %v755_v34  ;;  %v757_v37 = vmul.f32 1.442695, %v750_v35 }
 0x79c   :  { %1084 = vpow2.f32 %v757_v37 }
 0x79d   :  { %v742_v39 = vpop.xlane.xlu0 %741 }
 0x79e   :  { %v751_v40 = vsub.f32 %v723_v32, %v742_v39 }
 0x7a0   :  { %v759_v43 = vmul.f32 1.442695, %v751_v40 }
 0x7a1   :  { %v744_v45 = vpop.xlane.xlu0 %743 }
 0x7a2   :  { %1086 = vpow2.f32 %v759_v43  ;;  %v752_v46 = vsub.f32 %v726_v50, %v744_v45 }
 0x7a4   :  { %v1083_v49 = vpop.eup %1082  ;;  %v761_v51 = vmul.f32 1.442695, %v752_v46 }
 0x7a5   :  { %767 = vadd.xlane.f32.xlu1 %v1083_v49  ;;  %v746_v52 = vpop.xlane.xlu1 %745 }
 0x7a6   :  { %v1085_v54 = vpop.eup %1084  ;;  %1088 = vpow2.f32 %v761_v51  ;;  %v753_v55 = vsub.f32 %v731_v22, %v746_v52 }
 0x7a7   :  { %769 = vadd.xlane.f32.xlu0 %v1085_v54  ;;  %v748_v56 = vpop.xlane.xlu0 %747 }
 0x7a8   :  { %v763_v57 = vmul.f32 1.442695, %v753_v55  ;;  %v754_v58 = vsub.f32 %v734_v27, %v748_v56 }
 0x7aa   :  { %1090 = vpow2.f32 %v763_v57  ;;  %v765_v59 = vmul.f32 1.442695, %v754_v58 }
 0x7ac   :  { %v1087_v60 = vpop.eup %1086  ;;  %1092 = vpow2.f32 %v765_v59 }
 0x7ad   :  { %771 = vadd.xlane.f32.xlu1 %v1087_v60 }
 0x7b0   :  { %v1089_v61 = vpop.eup %1088 }
 0x7b1   :  { %773 = vadd.xlane.f32.xlu0 %v1089_v61 }
 0x7b4   :  { %v1091_v62 = vpop.eup %1090 }
 0x7b5   :  { %775 = vadd.xlane.f32.xlu1 %v1091_v62 }
 0x7b6   :  { %v1093_v63 = vpop.eup %1092 }
 0x7b7   :  { %777 = vadd.xlane.f32.xlu0 %v1093_v63 }
 0x832   :  { %v768_v1 = vpop.xlane.xlu1 %767 }
 0x833   :  { %1094 = vrcp.f32 %v768_v1 }
 0x834   :  { %v770_v2 = vpop.xlane.xlu0 %769 }
 0x835   :  { %1096 = vrcp.f32 %v770_v2 }
 0x83a   :  { %v772_v3 = vpop.xlane.xlu1 %771 }
 0x83b   :  { %1098 = vrcp.f32 %v772_v3 }
 0x83d   :  { %v1095_v4 = vpop.eup %1094 }
 0x83e   :  { %v780_v5 = vmul.f32 %v1095_v4, %v1083_v49  ;;  %v774_v6 = vpop.xlane.xlu0 %773 }
 0x83f   :  { %v1097_v7 = vpop.eup %1096  ;;  %1100 = vrcp.f32 %v774_v6 }
 0x840   :  { %791 = vst [vmem:[#allocation5] sm:$0xff] %v780_v5  ;;  %v782_v8 = vmul.f32 %v1097_v7, %v1085_v54 }
 0x842   :  { %792 = vst [vmem:[#allocation5 + $0x8] sm:$0xff] %v782_v8  ;;  %v776_v9 = vpop.xlane.xlu1 %775 }
 0x843   :  { %1102 = vrcp.f32 %v776_v9 }
 0x844   :  { %v778_v10 = vpop.xlane.xlu0 %777 }
 0x845   :  { %v1099_v11 = vpop.eup %1098  ;;  %1104 = vrcp.f32 %v778_v10 }
 0x846   :  { %v784_v12 = vmul.f32 %v1099_v11, %v1087_v60 }
 0x848   :  { %793 = vst [vmem:[#allocation5 + $0x10] sm:$0xff] %v784_v12 }
 0x849   :  { %v1101_v13 = vpop.eup %1100 }
 0x84a   :  { %v786_v16 = vmul.f32 %v1101_v13, %v1089_v61 }
 0x84c   :  { %794 = vst [vmem:[#allocation5 + $0x18] sm:$0xff] %v786_v16 }
 0x84d   :  { %v1103_v14 = vpop.eup %1102 }
 0x84e   :  { %v788_v15 = vmul.f32 %v1103_v14, %v1091_v62 }
 0x84f   :  { %v1105_v17 = vpop.eup %1104 }
 0x850   :  { %795 = vst [vmem:[#allocation5 + $0x20] sm:$0xff] %v788_v15  ;;  %v790_v18 = vmul.f32 %v1105_v17, %v1093_v63 }
 0x852   :  { %796 = vst [vmem:[#allocation5 + $0x28] sm:$0xff] %v790_v18 }
 0x853   :  { %1139 = shalt.err (!%p1136_p12)
}
 0x854   :  { %s1140_s16 = scalar_lea.hbm %s1457_s8, 768 }
 0x855   :  { %p1141_p13 = scmp.ne.s32.totalorder %s1457_s8, %s1140_s16  ;;  %p1144_p0 = scmp.lt.u32.totalorder %s1140_s16, %s1457_s8 }
 0x857   :  { %p1146_p1 = pnand %p1144_p0, %p1141_p13 }
 0x859   :  { %1149 = shalt.err (!%p1146_p1)
}
 0x85a   :  { %s1161_s4 = smov 128   ;;  %s1162_s1 = smov 8  }
 0x85b   :  { %808 = dma.vmem_to_hbm [thread:$0]  %s803_s0, 768, %s1457_s8, [#allocation4], %s1161_s4, %s1161_s4, %s1162_s1  }
 0x85c   :  { %1152 = dma.done.wait [#allocation4], 768  }
 0x85d   :  { %1153 = vsyncadd [#allocation4], 4294966528 }
 0x85e   :  { %812 = vsyncpa [#allocation3], 1 }
 0x85f   :  { %813 = vsyncpa [#allocation4], 1 }

</bundles_post_ra>
